<compile_context>
chip_gen: v7x
topology: tpu7x:2x2x1
jax: 0.10.0
libtpu: 0.0.40
codegen_flags: <defaults>
</compile_context>

<pallas_src>
import datetime
import numpy as np

import jax
import jax.numpy as jnp
from jax.experimental import pallas as pl
from jax.experimental.pallas import tpu as pltpu


MIN_TO_SEC = 60
HOUR_TO_MIN = 60
MAX_SECOND_PER_DAY = 24 * HOUR_TO_MIN * MIN_TO_SEC

_LANE = 128          # TPU lane width
_MAX_TILE_B = 4096   # lanes per grid step (multiple of 128)


def _rotation_kernel(ang_ref, x_ref, o_ref):
    """Rotate (cos, sin) rows by the angle whose (cos, sin) live in SMEM.

    ang_ref: (2,) float32 in SMEM -> [cos(dtheta), sin(dtheta)]
    x_ref:   (2, TILE_B) in VMEM  -> row 0 = cos(theta), row 1 = sin(theta)
    o_ref:   (2, TILE_B) in VMEM
    """
    cos_dt = ang_ref[0]
    sin_dt = ang_ref[1]
    cos = x_ref[0:1, :].astype(jnp.float32)
    sin = x_ref[1:2, :].astype(jnp.float32)
    # Two full-width (lane-dense) stores; no concat / masked stores.
    o_ref[0:1, :] = (cos * cos_dt - sin * sin_dt).astype(o_ref.dtype)
    o_ref[1:2, :] = (cos * sin_dt + sin * cos_dt).astype(o_ref.dtype)


def _round_up(n: int, m: int) -> int:
    return ((n + m - 1) // m) * m


def time_passing_forward(x: jax.Array, dt) -> jax.Array:
    """JAX/Pallas equivalent of TimePassing.forward.

    Args:
      x: array of shape (B, T, F) with F >= 2 (last two features are cos/sin
         of the time-of-day angle), matching the PyTorch (N, seq, feat) input.
      dt: datetime.timedelta (or seconds as a float) to advance by.

    Returns:
      Array of shape (B, 1, 2): the last timestep's (cos, sin) rotated by dt.
    """
    dt_sec = dt.total_seconds() if isinstance(dt, datetime.timedelta) else float(dt)
    angle = dt_sec / MAX_SECOND_PER_DAY * 2.0 * np.pi
    # Rotation constants as a runtime SMEM scalar input (no retrace per dt).
    angles = jnp.asarray([np.cos(angle), np.sin(angle)], dtype=jnp.float32)

    b = x.shape[0]
    # Glue: last timestep, last two features, batch on the lane axis -> (2, B).
    cs_t = jnp.transpose(x[:, -1, -2:])

    # Pad batch to a lane-dense tile size.
    tile_b = min(_MAX_TILE_B, _round_up(b, _LANE))
    b_pad = _round_up(b, tile_b)
    if b_pad != b:
        cs_t = jnp.pad(cs_t, ((0, 0), (0, b_pad - b)))

    grid = (b_pad // tile_b,)

    out = pl.pallas_call(
        _rotation_kernel,
        out_shape=jax.ShapeDtypeStruct((2, b_pad), cs_t.dtype),
        grid_spec=pltpu.PrefetchScalarGridSpec(
            num_scalar_prefetch=0,
            grid=grid,
            in_specs=[
                # (2,) rotation constants, whole array in SMEM each step.
                pl.BlockSpec(memory_space=pltpu.MemorySpace.SMEM),
                # (2, tile_b) lane-dense data tile.
                pl.BlockSpec((2, tile_b), lambda i: (0, i)),
            ],
            out_specs=pl.BlockSpec((2, tile_b), lambda i: (0, i)),
        ),
        compiler_params=pltpu.CompilerParams(
            dimension_semantics=("parallel",)),
    )(angles, cs_t)

    # Glue: drop padding, undo transpose, restore the (B, 1, 2) shape.
    return jnp.transpose(out[:, :b]).reshape(b, 1, 2)


def time_passing_reference(x: jax.Array, dt) -> jax.Array:
    """Pure-JAX reference mirroring the PyTorch code path."""
    dt_sec = dt.total_seconds() if isinstance(dt, datetime.timedelta) else float(dt)
    angle = dt_sec / MAX_SECOND_PER_DAY * 2.0 * np.pi
    xs = x[:, -1:, -2:]
    cos = xs[:, :, -2]
    sin = xs[:, :, -1]
    new_cos = cos * np.cos(angle) - sin * np.sin(angle)
    new_sin = cos * np.sin(angle) + sin * np.cos(angle)
    return jnp.stack([new_cos, new_sin], axis=-1)


if __name__ == "__main__":
    key = jax.random.PRNGKey(0)
    B, T, F = 2, 8, 4
    # Input whose last two features look like (cos, sin) of some phase.
    k1, k2 = jax.random.split(key)
    base = jax.random.normal(k1, (B, T, F), dtype=jnp.float32)
    phase = jax.random.uniform(k2, (B, T), dtype=jnp.float32) * 2.0 * np.pi
    x = base.at[:, :, -2].set(jnp.cos(phase)).at[:, :, -1].set(jnp.sin(phase))

    dt = datetime.timedelta(minutes=15)

    out = time_passing_forward(x, dt)
    out = jax.block_until_ready(out)

    ref = time_passing_reference(x, dt)
    assert out.shape == (B, 1, 2), out.shape
    np.testing.assert_allclose(np.asarray(out), np.asarray(ref), rtol=1e-6, atol=1e-6)

    # Second dt reuses the same compiled kernel (constants live in SMEM).
    dt2 = datetime.timedelta(hours=3, minutes=7)
    out2 = jax.block_until_ready(time_passing_forward(x, dt2))
    np.testing.assert_allclose(
        np.asarray(out2), np.asarray(time_passing_reference(x, dt2)),
        rtol=1e-6, atol=1e-6)

    print("KERNEL_OK")
</pallas_src>

<mosaic_0001>
module attributes {stable_mosaic.version = 11 : i64} {
  func.func @_rotation_kernel(%arg0: i32, %arg1: memref<2xf32, #tpu.memory_space<smem>>, %arg2: memref<2x128xf32, #tpu.memory_space<vmem>>, %arg3: memref<2x128xf32, #tpu.memory_space<vmem>>) attributes {dimension_semantics = [#tpu.dimension_semantics<parallel>], iteration_bounds = array<i64: 1>, scalar_prefetch = 0 : i64, scratch_operands = 0 : i64, tpu.core_type = #tpu.core_type<tc>, window_params = [{transform_indices = @transform_0, window_bounds = array<i64: 2>}, {transform_indices = @transform_1, window_bounds = array<i64: 2, 128>}, {transform_indices = @transform_2, window_bounds = array<i64: 2, 128>}]} {
    %c0 = arith.constant 0 : index
    %0 = memref.load %arg1[%c0] : memref<2xf32, #tpu.memory_space<smem>>
    %c1 = arith.constant 1 : index
    %1 = memref.load %arg1[%c1] : memref<2xf32, #tpu.memory_space<smem>>
    %c0_0 = arith.constant 0 : index
    %c0_1 = arith.constant 0 : index
    %2 = vector.load %arg2[%c0_0, %c0_1] : memref<2x128xf32, #tpu.memory_space<vmem>>, vector<1x128xf32>
    %c1_2 = arith.constant 1 : index
    %c0_3 = arith.constant 0 : index
    %3 = vector.load %arg2[%c1_2, %c0_3] : memref<2x128xf32, #tpu.memory_space<vmem>>, vector<1x128xf32>
    %4 = vector.broadcast %0 : f32 to vector<1x128xf32>
    %5 = arith.mulf %2, %4 : vector<1x128xf32>
    %6 = vector.broadcast %1 : f32 to vector<1x128xf32>
    %7 = arith.mulf %3, %6 : vector<1x128xf32>
    %8 = arith.subf %5, %7 : vector<1x128xf32>
    %c0_4 = arith.constant 0 : index
    %c0_5 = arith.constant 0 : index
    %9 = vector.load %arg3[%c0_4, %c0_5] : memref<2x128xf32, #tpu.memory_space<vmem>>, vector<1x128xf32>
    tpu.vector_store %arg3[%c0_4, %c0_5], %8 {strides = array<i32>} : memref<2x128xf32, #tpu.memory_space<vmem>>, vector<1x128xf32>,
    %10 = vector.broadcast %1 : f32 to vector<1x128xf32>
    %11 = arith.mulf %2, %10 : vector<1x128xf32>
    %12 = vector.broadcast %0 : f32 to vector<1x128xf32>
    %13 = arith.mulf %3, %12 : vector<1x128xf32>
    %14 = arith.addf %11, %13 : vector<1x128xf32>
    %c1_6 = arith.constant 1 : index
    %c0_7 = arith.constant 0 : index
    %15 = vector.load %arg3[%c1_6, %c0_7] : memref<2x128xf32, #tpu.memory_space<vmem>>, vector<1x128xf32>
    tpu.vector_store %arg3[%c1_6, %c0_7], %14 {strides = array<i32>} : memref<2x128xf32, #tpu.memory_space<vmem>>, vector<1x128xf32>,
    return
  }
  func.func @transform_0(%arg0: i32) -> i32 {
    %c0_i32 = arith.constant 0 : i32
    %c0_i32_0 = arith.constant 0 : i32
    return %c0_i32 : i32
  }
  func.func @transform_1(%arg0: i32) -> (i32, i32) {
    %c0_i32 = arith.constant 0 : i32
    %c0_i32_0 = arith.constant 0 : i32
    return %c0_i32, %arg0 : i32, i32
  }
  func.func @transform_2(%arg0: i32) -> (i32, i32) {
    %c0_i32 = arith.constant 0 : i32
    %c0_i32_0 = arith.constant 0 : i32
    return %c0_i32, %arg0 : i32, i32
  }
}

</mosaic_0001>

<bundles_post_ra>
// kernel: tpu_custom_call.1
= control target key start
LH: loop header
LB: loop body
LE: loop exit
PB: predicated region body
PF: predicated region fallthrough
CT: control target
= control target key end

     0   :  { %7 = vsyncpa [#allocation4], 0  ;;  %s138_s0 = inlined_call_operand.hbm [shape: f32[2], index: 0, kind: input, shape index: {}]   ;;  %s139_s1 = inlined_call_operand.vmem [shape: f32[2,128], index: 1, kind: input, shape index: {}]   ;;  %s140_s2 = inlined_call_operand.hbm [shape: f32[2,128], index: 2, kind: output, shape index: {}]  }
   0x1   :  { %8 = vsyncpa [#allocation3], 0  ;;  %s55_s11 = scalar_lea.hbm %s138_s0, 16 }
   0x2   :  { %p56_p0 = scmp.ne.s32.totalorder %s138_s0, %s55_s11  ;;  %p59_p1 = scmp.lt.u32.totalorder %s55_s11, %s138_s0 }
   0x4   :  { %p61_p2 = pnand %p59_p1, %p56_p0 }
   0x6   :  { %64 = shalt.err (!%p61_p2)
}
   0x7   :  { %s91_s16 = smov [#allocation2]  }
   0x8   :  { %16 = dma.hbm_to_smem %s138_s0, 16, %s91_s16, [#allocation4]  }
   0x9   :  { %87 = dma.done.wait [#allocation4], 16  }
   0xa   :  { %88 = vsyncadd [#allocation4], 4294967280 }
   0xb   :  { %22 = sfence }
   0xc   :  { %s23_s19 = sld [smem:[#allocation2]]  ;;  %s52_s20 = sld [smem:[#allocation2 + $0x1]]  ;;  %v25_v0 = vld [vmem:[%s139_s1] sm:$0x1]  ;;  %v26_v1 = vld [vmem:[%s139_s1 + $0x1] sm:$0x1] }
   0xd   :  { %s92_s25 = smov [#allocation5]  }
   0xe   :  { %s43_s26 = sshll.u32 %s92_s25, 4  ;;  %s44_s26 = int_to_ptr.vmem [resolvable:$true] %s43_s26 }
   0xf   :  { %s65_s0 = scalar_lea.vmem %s44_s26, 32  ;;  %p70_p4 = scmp.lt.s32.totalorder %s44_s26, %s44_s26 }
  0x10   :  { %p66_p3 = scmp.ne.s32.totalorder %s44_s26, %s65_s0  ;;  %p71_p5 = scmp.lt.s32.totalorder %s65_s0, %s65_s0 }
  0x12   :  { %v27_v2 = vstv %s23_s19  ;;  %v29_v3 = vstv %s52_s20  ;;  %p72_p6 = por %p71_p5, %p70_p4 }
  0x13   :  { %v28_v4 = vmul.f32 %v27_v2, %v25_v0  ;;  %v30_v5 = vmul.f32 %v29_v3, %v26_v1  ;;  %v33_v6 = vmul.f32 %v29_v3, %v25_v0  ;;  %v34_v7 = vmul.f32 %v27_v2, %v26_v1 }
  0x14   :  { %p73_p7 = pnand %p72_p6, %p66_p3 }
  0x15   :  { %v31_v8 = vsub.f32 %v28_v4, %v30_v5  ;;  %v35_v9 = vadd.f32 %v34_v7, %v33_v6 }
  0x17   :  { %32 = vst [vmem:[#allocation5] sm:$0x1] %v31_v8  ;;  %36 = vst [vmem:[#allocation5 + $0x1] sm:$0x1] %v35_v9 }
  0x18   :  { %76 = shalt.err (!%p73_p7)
}
  0x19   :  { %s77_s28 = scalar_lea.hbm %s140_s2, 32 }
  0x1a   :  { %p78_p8 = scmp.ne.s32.totalorder %s140_s2, %s77_s28  ;;  %p81_p9 = scmp.lt.u32.totalorder %s77_s28, %s140_s2 }
  0x1c   :  { %p83_p10 = pnand %p81_p9, %p78_p8 }
  0x1e   :  { %86 = shalt.err (!%p83_p10)
}
  0x1f   :  { %46 = dma.vmem_to_hbm [thread:$0]  %s44_s26, 32, %s140_s2, [#allocation3]  }
  0x20   :  { %89 = dma.done.wait [#allocation3], 32  }
  0x21   :  { %90 = vsyncadd [#allocation3], 4294967264 }
  0x22   :  { %50 = vsyncpa [#allocation3], 1 }
  0x23   :  { %51 = vsyncpa [#allocation4], 1 }

</bundles_post_ra>
